<compile_context>
chip_gen: v7x
topology: tpu7x:2x2x1
jax: 0.10.0
libtpu: 0.0.40
codegen_flags: <defaults>
</compile_context>

<pallas_src>
import functools
import math

import jax
import jax.numpy as jnp
from jax import lax
from jax.experimental import pallas as pl
from jax.experimental.pallas import tpu as pltpu


def _round_up(x, m):
    return (x + m - 1) // m * m


# ----------------------------------------------------------------------------
# Pallas kernel: fused bidirectional zoneout-LSTM recurrence
# ----------------------------------------------------------------------------
def _zoneout_bilstm_kernel(gx_ref, whh_ref, *rest, seq_len, hidden_pad,
                           zoneout_cell, zoneout_hidden, is_training):
    """
    gx_ref  : [T, 2*Bp, 4*Hp] f32  -- precomputed x @ W_ih^T + bias.
              rows [0, Bp)   = forward direction input gates at time t
              rows [Bp, 2Bp) = backward direction input gates at time T-1-t
    whh_ref : [Hp, 4*Hp] (bf16/f32) -- W_hh^T, zero padded per gate.
    mask_ref: [T, 2*Bp, 2*Hp] f32 (training only) -- zoneout multipliers,
              [..., :Hp] for the cell state, [..., Hp:] for the hidden state.
    out_ref : [2*T, Bp, Hp] f32 -- indices [0,T) forward h_t,
              indices [T,2T) backward h_t (natural time order).
    """
    if is_training:
        mask_ref, out_ref = rest
    else:
        (out_ref,) = rest

    T = seq_len
    Hp = hidden_pad
    B2 = gx_ref.shape[1]          # 2 * Bp
    Bp = B2 // 2

    whh = whh_ref[...]            # hoisted: resident across the whole loop
    mm_dtype = whh.dtype

    def step(t, carry):
        h, c = carry              # f32 (2Bp, Hp)

        # One recurrent MXU matmul serves both directions.
        gates = gx_ref[t] + jnp.dot(h.astype(mm_dtype), whh,
                                    preferred_element_type=jnp.float32)

        i = jax.nn.sigmoid(gates[:, 0 * Hp:1 * Hp])
        f = jax.nn.sigmoid(gates[:, 1 * Hp:2 * Hp])
        g = jnp.tanh(gates[:, 2 * Hp:3 * Hp])
        o = jax.nn.sigmoid(gates[:, 3 * Hp:4 * Hp])
        c_new = f * c + i * g
        h_new = o * jnp.tanh(c_new)

        if is_training:
            m = mask_ref[t]                      # (2Bp, 2Hp), one draw per step
            m_c = m[:, :Hp]
            m_h = m[:, Hp:]
        else:
            m_c = jnp.float32(1.0 - zoneout_cell)
            m_h = jnp.float32(1.0 - zoneout_hidden)

        # state' = old + m * (new - old)
        #   eval:  (1-z)*new + z*old
        #   train: (1-z)*dropout(new-old, p=1-z) + old  (m = (1-z)/z * Bernoulli(z))
        c2 = c + m_c * (c_new - c)
        h2 = h + m_h * (h_new - h)

        # Separate fwd/bwd slabs -> no read-modify-write on out_ref.
        out_ref[t] = h2[:Bp].astype(out_ref.dtype)               # forward @ t
        out_ref[2 * T - 1 - t] = h2[Bp:].astype(out_ref.dtype)   # backward @ T-1-t
        return (h2, c2)

    h0 = jnp.zeros((B2, Hp), jnp.float32)
    c0 = jnp.zeros((B2, Hp), jnp.float32)
    lax.fori_loop(0, T, step, (h0, c0))


# ----------------------------------------------------------------------------
# Wrapper
# ----------------------------------------------------------------------------
def zoneout_bilstm_encoder(inputs, w_ih, w_hh, b_ih, b_hh, *,
                           zoneout_cell=0.1, zoneout_hidden=0.1,
                           is_training=False, rng_key=None,
                           mm_dtype=jnp.bfloat16):
    """Bidirectional zoneout LSTM encoder.

    inputs : [T, B, C] (time-major, as in the PyTorch module)
    w_ih   : [4H, C], w_hh : [4H, H], b_ih/b_hh : [4H]  (nn.LSTMCell params,
             gate order i, f, g, o)
    Returns [T, B, H] = forward hidden states + backward hidden states.
    """
    # TODO(synk): optional externally supplied (hidden_state, cell_state) init
    # is not plumbed through; zeros are used (the module's default-None path).
    T, B, C = inputs.shape
    H = w_hh.shape[1]
    assert w_ih.shape == (4 * H, C) and w_hh.shape == (4 * H, H)

    # Lane/sublane-aligned padded sizes.
    Hp = _round_up(H, 128)
    Bp = _round_up(B, 8)

    f32 = jnp.float32
    x = inputs.astype(f32)

    # Per-gate padded, transposed weights: W^T laid out as [in, 4*Hp] with gate k
    # occupying columns [k*Hp, k*Hp + H).  Padded rows/cols (and bias) are zero,
    # so padded hidden lanes stay exactly 0 through the whole recurrence.
    wih_g = jnp.asarray(w_ih, f32).reshape(4, H, C)
    whh_g = jnp.asarray(w_hh, f32).reshape(4, H, H)
    bias_g = (jnp.asarray(b_ih, f32) + jnp.asarray(b_hh, f32)).reshape(4, H)

    wih_t = jnp.zeros((C, 4, Hp), f32).at[:, :, :H].set(
        jnp.transpose(wih_g, (2, 0, 1))).reshape(C, 4 * Hp)
    whh_t = jnp.zeros((Hp, 4, Hp), f32).at[:H, :, :H].set(
        jnp.transpose(whh_g, (2, 0, 1))).reshape(Hp, 4 * Hp)
    bias = jnp.zeros((4, Hp), f32).at[:, :H].set(bias_g).reshape(4 * Hp)

    # Hoisted input projection: one large MXU-friendly GEMM, bias folded in.
    gx = jnp.einsum('tbc,cg->tbg',
                    x.astype(mm_dtype), wih_t.astype(mm_dtype),
                    preferred_element_type=f32) + bias          # [T, B, 4Hp]

    # Fuse the two directions along the batch dim of the per-step gate slab:
    # rows [0,B) = forward inputs x[t], rows [Bp, Bp+B) = backward inputs x[T-1-t].
    gates_in = jnp.zeros((T, 2 * Bp, 4 * Hp), f32)
    gates_in = gates_in.at[:, :B, :].set(gx)
    gates_in = gates_in.at[:, Bp:Bp + B, :].set(gx[::-1])

    operands = [gates_in, whh_t.astype(mm_dtype)]
    in_specs = [pl.BlockSpec(memory_space=pltpu.MemorySpace.VMEM),
                pl.BlockSpec(memory_space=pltpu.MemorySpace.VMEM)]

    if is_training:
        if rng_key is None:
            rng_key = jax.random.PRNGKey(0)
        kc, kh = jax.random.split(rng_key)

        def zmask(key, z):
            # Multiplier m so that state' = old + m*(new-old) reproduces
            # (1-z) * dropout(new-old, p=1-z) + old  (torch dropout keeps with
            # prob z and scales kept values by 1/z).
            z = float(z)
            if z <= 0.0 or z >= 1.0:
                return jnp.zeros((T, 2 * Bp, Hp), f32)
            keep = jax.random.bernoulli(key, p=z, shape=(T, 2 * Bp, Hp))
            return keep.astype(f32) * ((1.0 - z) / z)

        masks = jnp.concatenate([zmask(kc, zoneout_cell),
                                 zmask(kh, zoneout_hidden)], axis=-1)
        operands.append(masks)
        in_specs.append(pl.BlockSpec(memory_space=pltpu.MemorySpace.VMEM))

    kernel = functools.partial(
        _zoneout_bilstm_kernel,
        seq_len=T, hidden_pad=Hp,
        zoneout_cell=float(zoneout_cell),
        zoneout_hidden=float(zoneout_hidden),
        is_training=bool(is_training))

    mm_itemsize = jnp.dtype(mm_dtype).itemsize
    vmem_need = (gates_in.size * 4                       # gate slab
                 + 2 * T * Bp * Hp * 4                   # output slabs
                 + whh_t.size * mm_itemsize              # recurrent weights
                 + (T * 2 * Bp * 2 * Hp * 4 if is_training else 0))
    vmem_limit = min(128 * 1024 * 1024,
                     max(32 * 1024 * 1024, int(1.5 * vmem_need) + (2 << 20)))

    out_flat = pl.pallas_call(
        kernel,
        out_shape=jax.ShapeDtypeStruct((2 * T, Bp, Hp), f32),
        in_specs=in_specs,
        out_specs=pl.BlockSpec(memory_space=pltpu.MemorySpace.VMEM),
        compiler_params=pltpu.CompilerParams(vmem_limit_bytes=vmem_limit),
    )(*operands)

    out = out_flat.reshape(2, T, Bp, Hp)
    return (out[0] + out[1])[:, :B, :H]     # fwd + bwd, un-padded


# ----------------------------------------------------------------------------
# Pure-JAX reference (eval mode) for verification
# ----------------------------------------------------------------------------
def _reference_eval(inputs, w_ih, w_hh, b_ih, b_hh, zc, zh):
    T, B, _ = inputs.shape
    H = w_hh.shape[1]

    def cell(x, h, c):
        gates = x @ w_ih.T + b_ih + h @ w_hh.T + b_hh
        i, f, g, o = jnp.split(gates, 4, axis=1)
        i, f, o = jax.nn.sigmoid(i), jax.nn.sigmoid(f), jax.nn.sigmoid(o)
        g = jnp.tanh(g)
        c_new = f * c + i * g
        h_new = o * jnp.tanh(c_new)
        return h_new, c_new

    def step(carry, x):
        h, c = carry
        hn, cn = cell(x, h, c)
        c2 = (1 - zc) * cn + zc * c
        h2 = (1 - zh) * hn + zh * h
        return (h2, c2), h2

    init = (jnp.zeros((B, H), jnp.float32), jnp.zeros((B, H), jnp.float32))
    _, out_f = lax.scan(step, init, inputs)
    _, out_b_rev = lax.scan(step, init, inputs[::-1])
    return out_f + out_b_rev[::-1]


# ----------------------------------------------------------------------------
# Demo
# ----------------------------------------------------------------------------
if __name__ == "__main__":
    T, B, C, H = 8, 2, 16, 32          # seq, batch, input_size, hidden_size
    zc, zh = 0.1, 0.1

    key = jax.random.PRNGKey(0)
    k_x, k_wih, k_whh, k_bih, k_bhh = jax.random.split(key, 5)

    # PyTorch nn.LSTMCell init: U(-1/sqrt(H), 1/sqrt(H)).
    s = 1.0 / float(math.sqrt(H))
    inputs = jax.random.normal(k_x, (T, B, C), jnp.float32)
    w_ih = jax.random.uniform(k_wih, (4 * H, C), jnp.float32, -s, s)
    w_hh = jax.random.uniform(k_whh, (4 * H, H), jnp.float32, -s, s)
    b_ih = jax.random.uniform(k_bih, (4 * H,), jnp.float32, -s, s)
    b_hh = jax.random.uniform(k_bhh, (4 * H,), jnp.float32, -s, s)

    ref = _reference_eval(inputs, w_ih, w_hh, b_ih, b_hh, zc, zh)

    # Eval path, f32 matmuls (tight check vs the pure-JAX reference).
    out_f32 = zoneout_bilstm_encoder(
        inputs, w_ih, w_hh, b_ih, b_hh,
        zoneout_cell=zc, zoneout_hidden=zh,
        is_training=False, mm_dtype=jnp.float32)
    out_f32 = jax.block_until_ready(out_f32)
    assert out_f32.shape == (T, B, H)
    assert jnp.allclose(out_f32, ref, atol=1e-3, rtol=1e-3), "f32 mismatch vs reference"

    # Eval path, bf16 matmuls (default fast path; looser tolerance).
    out_bf16 = zoneout_bilstm_encoder(
        inputs, w_ih, w_hh, b_ih, b_hh,
        zoneout_cell=zc, zoneout_hidden=zh,
        is_training=False, mm_dtype=jnp.bfloat16)
    out_bf16 = jax.block_until_ready(out_bf16)
    assert out_bf16.shape == (T, B, H)
    assert jnp.allclose(out_bf16, ref, atol=5e-2, rtol=5e-2), "bf16 mismatch vs reference"

    # Training path (stochastic zoneout; masks pre-sampled with jax.random —
    # distributionally equivalent to torch's dropout, not bitwise identical).
    out_train = zoneout_bilstm_encoder(
        inputs, w_ih, w_hh, b_ih, b_hh,
        zoneout_cell=zc, zoneout_hidden=zh,
        is_training=True, rng_key=jax.random.PRNGKey(1234))
    out_train = jax.block_until_ready(out_train)
    assert out_train.shape == (T, B, H)
    assert bool(jnp.all(jnp.isfinite(out_train)))

    print("KERNEL_OK")
</pallas_src>

<mosaic_0001>
module attributes {stable_mosaic.version = 11 : i64} {
  func.func @_zoneout_bilstm_kernel(%arg0: memref<8x16x512xf32, #tpu.memory_space<vmem>>, %arg1: memref<128x512xf32, #tpu.memory_space<vmem>>, %arg2: memref<16x8x128xf32, #tpu.memory_space<vmem>>) attributes {dimension_semantics = [], scalar_prefetch = 0 : i64, scratch_operands = 0 : i64, tpu.core_type = #tpu.core_type<tc>} {
    %c0 = arith.constant 0 : index
    %c0_0 = arith.constant 0 : index
    %0 = vector.load %arg1[%c0, %c0_0] : memref<128x512xf32, #tpu.memory_space<vmem>>, vector<128x512xf32>
    %cst = arith.constant 0.000000e+00 : f32
    %1 = vector.broadcast %cst : f32 to vector<16x128xf32>
    %cst_1 = arith.constant 0.000000e+00 : f32
    %2 = vector.broadcast %cst_1 : f32 to vector<16x128xf32>
    %c0_i32 = arith.constant 0 : i32
    %c8_i32 = arith.constant 8 : i32
    %3 = arith.addi %c0_i32, %c8_i32 : i32
    %c1_i32 = arith.constant 1 : i32
    %4:2 = scf.for %arg3 = %c0_i32 to %3 step %c1_i32 iter_args(%arg4 = %1, %arg5 = %2) -> (vector<16x128xf32>, vector<16x128xf32>)  : i32 {
      %5 = arith.index_cast %arg3 : i32 to index
      %c0_3 = arith.constant 0 : index
      %c0_4 = arith.constant 0 : index
      %6 = vector.load %arg0[%5, %c0_3, %c0_4] : memref<8x16x512xf32, #tpu.memory_space<vmem>>, vector<1x16x512xf32>
      %7 = vector.shape_cast %6 : vector<1x16x512xf32> to vector<16x512xf32>
      %cst_5 = arith.constant dense<0.000000e+00> : vector<16x512xf32>
      %8 = tpu.matmul %arg4, %0, %cst_5 {dimension_numbers = #tpu.dot_dimension_numbers<[1], [0], [0], [1], [0, 0, 1, 1], [], []>} : vector<16x128xf32>, vector<128x512xf32>, vector<16x512xf32> -> vector<16x512xf32>
      %9 = arith.addf %7, %8 : vector<16x512xf32>
      %10 = vector.extract_strided_slice %9 {offsets = [0, 0], sizes = [16, 128], strides = [1, 1]} : vector<16x512xf32> to vector<16x128xf32>
      %11 = arith.negf %10 : vector<16x128xf32>
      %12 = math.exp %11 : vector<16x128xf32>
      %cst_6 = arith.constant 1.000000e+00 : f32
      %13 = vector.broadcast %cst_6 : f32 to vector<16x128xf32>
      %14 = arith.addf %13, %12 : vector<16x128xf32>
      %15 = arith.divf %13, %14 : vector<16x128xf32>
      %16 = vector.extract_strided_slice %9 {offsets = [0, 128], sizes = [16, 128], strides = [1, 1]} : vector<16x512xf32> to vector<16x128xf32>
      %17 = arith.negf %16 : vector<16x128xf32>
      %18 = math.exp %17 : vector<16x128xf32>
      %cst_7 = arith.constant 1.000000e+00 : f32
      %19 = vector.broadcast %cst_7 : f32 to vector<16x128xf32>
      %20 = arith.addf %19, %18 : vector<16x128xf32>
      %21 = arith.divf %19, %20 : vector<16x128xf32>
      %22 = vector.extract_strided_slice %9 {offsets = [0, 256], sizes = [16, 128], strides = [1, 1]} : vector<16x512xf32> to vector<16x128xf32>
      %23 = math.tanh %22 : vector<16x128xf32>
      %24 = vector.extract_strided_slice %9 {offsets = [0, 384], sizes = [16, 128], strides = [1, 1]} : vector<16x512xf32> to vector<16x128xf32>
      %25 = arith.negf %24 : vector<16x128xf32>
      %26 = math.exp %25 : vector<16x128xf32>
      %cst_8 = arith.constant 1.000000e+00 : f32
      %27 = vector.broadcast %cst_8 : f32 to vector<16x128xf32>
      %28 = arith.addf %27, %26 : vector<16x128xf32>
      %29 = arith.divf %27, %28 : vector<16x128xf32>
      %30 = arith.mulf %21, %arg5 : vector<16x128xf32>
      %31 = arith.mulf %15, %23 : vector<16x128xf32>
      %32 = arith.addf %30, %31 : vector<16x128xf32>
      %33 = math.tanh %32 : vector<16x128xf32>
      %34 = arith.mulf %29, %33 : vector<16x128xf32>
      %35 = arith.subf %32, %arg5 : vector<16x128xf32>
      %cst_9 = arith.constant 0.899999976 : f32
      %36 = vector.broadcast %cst_9 : f32 to vector<16x128xf32>
      %37 = arith.mulf %36, %35 : vector<16x128xf32>
      %38 = arith.addf %arg5, %37 : vector<16x128xf32>
      %39 = arith.subf %34, %arg4 : vector<16x128xf32>
      %cst_10 = arith.constant 0.899999976 : f32
      %40 = vector.broadcast %cst_10 : f32 to vector<16x128xf32>
      %41 = arith.mulf %40, %39 : vector<16x128xf32>
      %42 = arith.addf %arg4, %41 : vector<16x128xf32>
      %43 = vector.extract_strided_slice %42 {offsets = [0, 0], sizes = [8, 128], strides = [1, 1]} : vector<16x128xf32> to vector<8x128xf32>
      %44 = arith.index_cast %arg3 : i32 to index
      %c0_11 = arith.constant 0 : index
      %c0_12 = arith.constant 0 : index
      %45 = vector.load %arg2[%44, %c0_11, %c0_12] : memref<16x8x128xf32, #tpu.memory_space<vmem>>, vector<1x8x128xf32>
      %46 = vector.shape_cast %45 : vector<1x8x128xf32> to vector<8x128xf32>
      %47 = vector.shape_cast %43 : vector<8x128xf32> to vector<1x8x128xf32>
      tpu.vector_store %arg2[%44, %c0_11, %c0_12], %47 {strides = array<i32>} : memref<16x8x128xf32, #tpu.memory_space<vmem>>, vector<1x8x128xf32>,
      %48 = vector.extract_strided_slice %42 {offsets = [8, 0], sizes = [8, 128], strides = [1, 1]} : vector<16x128xf32> to vector<8x128xf32>
      %c15_i32 = arith.constant 15 : i32
      %49 = arith.subi %c15_i32, %arg3 : i32
      %50 = arith.index_cast %49 : i32 to index
      %c0_13 = arith.constant 0 : index
      %c0_14 = arith.constant 0 : index
      %51 = vector.load %arg2[%50, %c0_13, %c0_14] : memref<16x8x128xf32, #tpu.memory_space<vmem>>, vector<1x8x128xf32>
      %52 = vector.shape_cast %51 : vector<1x8x128xf32> to vector<8x128xf32>
      %53 = vector.shape_cast %48 : vector<8x128xf32> to vector<1x8x128xf32>
      tpu.vector_store %arg2[%50, %c0_13, %c0_14], %53 {strides = array<i32>} : memref<16x8x128xf32, #tpu.memory_space<vmem>>, vector<1x8x128xf32>,
      scf.yield %42, %38 : vector<16x128xf32>, vector<16x128xf32>
    }
    %c8_i32_2 = arith.constant 8 : i32
    return
  }
}

</mosaic_0001>

<bundles_post_ra>
// kernel: tpu_custom_call.1
= control target key start
LH: loop header
LB: loop body
LE: loop exit
PB: predicated region body
PF: predicated region fallthrough
CT: control target
= control target key end

     0   :  { %7 = vsyncpa [#allocation3], 0  ;;  %s974_s0 = inlined_call_operand.hbm [shape: f32[8,16,512], index: 0, kind: input, shape index: {}]   ;;  %s975_s1 = inlined_call_operand.hbm [shape: f32[128,512], index: 1, kind: input, shape index: {}]   ;;  %s976_s2 = inlined_call_operand.hbm [shape: f32[16,8,128], index: 2, kind: output, shape index: {}]  }
   0x1   :  { %8 = vsyncpa [#allocation6], 0 }
   0x2   :  { %9 = vsyncpa [#allocation4], 0  ;;  %s660_s9 = smov [#allocation2]   ;;  %s548_s13 = scalar_lea.hbm %s974_s0, 8192 }
   0x3   :  { %s15_s10 = sshll.u32 %s660_s9, 4  ;;  %p549_p0 = scmp.ne.s32.totalorder %s974_s0, %s548_s13  ;;  %s16_s10 = int_to_ptr.vmem [resolvable:$true] %s15_s10 }
   0x4   :  { %p552_p1 = scmp.lt.u32.totalorder %s548_s13, %s974_s0 }
   0x6   :  { %p554_p2 = pnand %p552_p1, %p549_p0 }
   0x8   :  { %557 = shalt.err (!%p554_p2)
}
   0x9   :  { %s558_s18 = scalar_lea.vmem %s16_s10, 8192  ;;  %p563_p4 = scmp.lt.s32.totalorder %s16_s10, %s16_s10 }
   0xa   :  { %p559_p3 = scmp.ne.s32.totalorder %s16_s10, %s558_s18  ;;  %p564_p5 = scmp.lt.s32.totalorder %s558_s18, %s558_s18 }
   0xc   :  { %p565_p6 = por %p564_p5, %p563_p4 }
   0xe   :  { %p566_p7 = pnand %p565_p6, %p559_p3 }
  0x10   :  { %569 = shalt.err (!%p566_p7)
}
  0x11   :  { %s661_s19 = smov 512   ;;  %s662_s20 = smov 32  }
  0x12   :  { %21 = dma.hbm_to_vmem [thread:$0]  %s974_s0, 8192, %s16_s10, [#allocation3], %s661_s19, %s661_s19, %s662_s20  }
  0x13   :  { %s663_s23 = smov [#allocation5]   ;;  %s570_s27 = scalar_lea.hbm %s975_s1, 8192 }
  0x14   :  { %s27_s24 = sshll.u32 %s663_s23, 4  ;;  %p571_p8 = scmp.ne.s32.totalorder %s975_s1, %s570_s27  ;;  %s28_s24 = int_to_ptr.vmem [resolvable:$true] %s27_s24 }
  0x15   :  { %p574_p9 = scmp.lt.u32.totalorder %s570_s27, %s975_s1 }
  0x17   :  { %p576_p10 = pnand %p574_p9, %p571_p8 }
  0x19   :  { %579 = shalt.err (!%p576_p10)
}
  0x1a   :  { %s580_s4 = scalar_lea.vmem %s28_s24, 8192  ;;  %p585_p12 = scmp.lt.s32.totalorder %s28_s24, %s28_s24 }
  0x1b   :  { %p581_p11 = scmp.ne.s32.totalorder %s28_s24, %s580_s4  ;;  %p586_p13 = scmp.lt.s32.totalorder %s580_s4, %s580_s4 }
  0x1d   :  { %p587_p0 = por %p586_p13, %p585_p12 }
  0x1f   :  { %p588_p1 = pnand %p587_p0, %p581_p11 }
  0x21   :  { %591 = shalt.err (!%p588_p1)
}
  0x22   :  { %33 = dma.hbm_to_vmem [thread:$0]  %s975_s1, 8192, %s28_s24, [#allocation6], %s661_s19, %s661_s19, %s662_s20  }
  0x23   :  { %634 = dma.done.wait [#allocation3], 8192  }
  0x24   :  { %635 = vsyncadd [#allocation3], 4294959104 }
  0x25   :  { %636 = dma.done.wait [#allocation6], 8192  }
  0x26   :  { %637 = vsyncadd [#allocation6], 4294959104  ;;  %v707_v0 = vld [vmem:[#allocation5] sm:$0xff]  ;;  %v709_v1 = vld [vmem:[#allocation5 + $0x8] sm:$0xff]  ;;  %s843_s1 = smov 0  }
  0x27   :  { %981 = vst [vmem:[#allocation11_spill] sm:$0xff] %v707_v0  ;;  %982 = vst [vmem:[#allocation12_spill] sm:$0xff] %v709_v1  ;;  %v711_v2 = vld [vmem:[#allocation5 + $0x10] sm:$0xff]  ;;  %v713_v3 = vld [vmem:[#allocation5 + $0x18] sm:$0xff] }
  0x28   :  { %983 = vst [vmem:[#allocation13_spill] sm:$0xff] %v711_v2  ;;  %984 = vst [vmem:[#allocation14_spill] sm:$0xff] %v713_v3  ;;  %v715_v4 = vld [vmem:[#allocation5 + $0x20] sm:$0xff]  ;;  %v717_v5 = vld [vmem:[#allocation5 + $0x28] sm:$0xff] }
  0x29   :  { %985 = vst [vmem:[#allocation15_spill] sm:$0xff] %v715_v4  ;;  %986 = vst [vmem:[#allocation16_spill] sm:$0xff] %v717_v5  ;;  %v719_v6 = vld [vmem:[#allocation5 + $0x30] sm:$0xff]  ;;  %v721_v7 = vld [vmem:[#allocation5 + $0x38] sm:$0xff] }
  0x2a   :  { %987 = vst [vmem:[#allocation17_spill] sm:$0xff] %v719_v6  ;;  %988 = vst [vmem:[#allocation18_spill] sm:$0xff] %v721_v7  ;;  %v723_v8 = vld [vmem:[#allocation5 + $0x40] sm:$0xff]  ;;  %v725_v9 = vld [vmem:[#allocation5 + $0x48] sm:$0xff] }
  0x2b   :  { %989 = vst [vmem:[#allocation19_spill] sm:$0xff] %v723_v8  ;;  %990 = vst [vmem:[#allocation20_spill] sm:$0xff] %v725_v9  ;;  %v727_v10 = vld [vmem:[#allocation5 + $0x50] sm:$0xff]  ;;  %v729_v11 = vld [vmem:[#allocation5 + $0x58] sm:$0xff] }
  0x2c   :  { %991 = vst [vmem:[#allocation21_spill] sm:$0xff] %v727_v10  ;;  %992 = vst [vmem:[#allocation22_spill] sm:$0xff] %v729_v11  ;;  %v731_v12 = vld [vmem:[#allocation5 + $0x60] sm:$0xff]  ;;  %v733_v13 = vld [vmem:[#allocation5 + $0x68] sm:$0xff] }
  0x2d   :  { %993 = vst [vmem:[#allocation23_spill] sm:$0xff] %v731_v12  ;;  %994 = vst [vmem:[#allocation24_spill] sm:$0xff] %v733_v13  ;;  %v735_v14 = vld [vmem:[#allocation5 + $0x70] sm:$0xff]  ;;  %v737_v15 = vld [vmem:[#allocation5 + $0x78] sm:$0xff] }
  0x2e   :  { %995 = vst [vmem:[#allocation25_spill] sm:$0xff] %v735_v14  ;;  %996 = vst [vmem:[#allocation26_spill] sm:$0xff] %v737_v15  ;;  %v739_v16 = vld [vmem:[#allocation5 + $0x80] sm:$0xff]  ;;  %v741_v17 = vld [vmem:[#allocation5 + $0x88] sm:$0xff] }
  0x2f   :  { %997 = vst [vmem:[#allocation27_spill] sm:$0xff] %v739_v16  ;;  %998 = vst [vmem:[#allocation28_spill] sm:$0xff] %v741_v17  ;;  %v743_v18 = vld [vmem:[#allocation5 + $0x90] sm:$0xff]  ;;  %v745_v19 = vld [vmem:[#allocation5 + $0x98] sm:$0xff] }
  0x30   :  { %999 = vst [vmem:[#allocation29_spill] sm:$0xff] %v743_v18  ;;  %v747_v20 = vld [vmem:[#allocation5 + $0xa0] sm:$0xff]  ;;  %v749_v21 = vld [vmem:[#allocation5 + $0xa8] sm:$0xff]  ;;  %v751_v22 = vld [vmem:[#allocation5 + $0xb0] sm:$0xff] }
  0x31   :  { %v753_v23 = vld [vmem:[#allocation5 + $0xb8] sm:$0xff]  ;;  %v755_v24 = vld [vmem:[#allocation5 + $0xc0] sm:$0xff]  ;;  %v757_v25 = vld [vmem:[#allocation5 + $0xc8] sm:$0xff] }
  0x32   :  { %v759_v26 = vld [vmem:[#allocation5 + $0xd0] sm:$0xff]  ;;  %v761_v27 = vld [vmem:[#allocation5 + $0xd8] sm:$0xff]  ;;  %v763_v28 = vld [vmem:[#allocation5 + $0xe0] sm:$0xff] }
  0x33   :  { %v765_v29 = vld [vmem:[#allocation5 + $0xe8] sm:$0xff]  ;;  %v767_v30 = vld [vmem:[#allocation5 + $0xf0] sm:$0xff]  ;;  %v769_v31 = vld [vmem:[#allocation5 + $0xf8] sm:$0xff] }
  0x34   :  { %v771_v32 = vld [vmem:[#allocation5 + $0x100] sm:$0xff]  ;;  %v773_v33 = vld [vmem:[#allocation5 + $0x108] sm:$0xff]  ;;  %v775_v34 = vld [vmem:[#allocation5 + $0x110] sm:$0xff] }
  0x35   :  { %v777_v35 = vld [vmem:[#allocation5 + $0x118] sm:$0xff]  ;;  %v779_v36 = vld [vmem:[#allocation5 + $0x120] sm:$0xff]  ;;  %v781_v37 = vld [vmem:[#allocation5 + $0x128] sm:$0xff] }
  0x36   :  { %v783_v38 = vld [vmem:[#allocation5 + $0x130] sm:$0xff]  ;;  %v785_v39 = vld [vmem:[#allocation5 + $0x138] sm:$0xff]  ;;  %v787_v40 = vld [vmem:[#allocation5 + $0x140] sm:$0xff] }
  0x37   :  { %v789_v41 = vld [vmem:[#allocation5 + $0x148] sm:$0xff]  ;;  %v791_v42 = vld [vmem:[#allocation5 + $0x150] sm:$0xff]  ;;  %v793_v43 = vld [vmem:[#allocation5 + $0x158] sm:$0xff] }
  0x38   :  { %v795_v44 = vld [vmem:[#allocation5 + $0x160] sm:$0xff]  ;;  %v797_v45 = vld [vmem:[#allocation5 + $0x168] sm:$0xff]  ;;  %v799_v46 = vld [vmem:[#allocation5 + $0x170] sm:$0xff] }
  0x39   :  { %v801_v47 = vld [vmem:[#allocation5 + $0x178] sm:$0xff]  ;;  %v803_v48 = vld [vmem:[#allocation5 + $0x180] sm:$0xff]  ;;  %v805_v49 = vld [vmem:[#allocation5 + $0x188] sm:$0xff] }
  0x3a   :  { %v807_v50 = vld [vmem:[#allocation5 + $0x190] sm:$0xff]  ;;  %v809_v51 = vld [vmem:[#allocation5 + $0x198] sm:$0xff]  ;;  %v811_v52 = vld [vmem:[#allocation5 + $0x1a0] sm:$0xff] }
  0x3b   :  { %1000 = vst [vmem:[#allocation30_spill] sm:$0xff] %v807_v50  ;;  %1001 = vst [vmem:[#allocation31_spill] sm:$0xff] %v811_v52  ;;  %v813_v53 = vld [vmem:[#allocation5 + $0x1a8] sm:$0xff]  ;;  %v815_v54 = vld [vmem:[#allocation5 + $0x1b0] sm:$0xff]  ;;  %v835_v50 = vmov 0.0   ;;  %v839_v52 = vmov 0.0  }
  0x3c   :  { %1002 = vst [vmem:[#allocation32_spill] sm:$0xff] %v815_v54  ;;  %v817_v55 = vld [vmem:[#allocation5 + $0x1b8] sm:$0xff]  ;;  %v819_v56 = vld [vmem:[#allocation5 + $0x1c0] sm:$0xff]  ;;  %v821_v57 = vld [vmem:[#allocation5 + $0x1c8] sm:$0xff]  ;;  %v837_v54 = vmov 0.0  }
  0x3d   :  { %1003 = vst [vmem:[#allocation33_spill] sm:$0xff] %v819_v56  ;;  %v823_v58 = vld [vmem:[#allocation5 + $0x1d0] sm:$0xff]  ;;  %v825_v59 = vld [vmem:[#allocation5 + $0x1d8] sm:$0xff]  ;;  %v827_v60 = vld [vmem:[#allocation5 + $0x1e0] sm:$0xff]  ;;  %v841_v56 = vmov 0.0  }
  0x3e   :  { %1004 = vst [vmem:[#allocation34_spill] sm:$0xff] %v823_v58  ;;  %v829_v61 = vld [vmem:[#allocation5 + $0x1e8] sm:$0xff]  ;;  %v831_v62 = vld [vmem:[#allocation5 + $0x1f0] sm:$0xff]  ;;  %v833_v63 = vld [vmem:[#allocation5 + $0x1f8] sm:$0xff] }
  0x3f   :  { %1005 = vst [vmem:[#allocation35_spill] sm:$0xff] %v831_v62 }
  0x40 LB: > { %1006 = vst [vmem:[#allocation36_spill] sm:$0xff] %v642_v50  ;;  %1007 = vst [vmem:[#allocation37_spill] sm:$0xff] %v646_v54  ;;  %v1010_v1 = vld [vmem:[#allocation12_spill] sm:$0xff]  ;;  %v1012_v0 = vld [vmem:[#allocation11_spill] sm:$0xff]  ;;  %s403_s6 = sshll.u32 %s658_s1, 6  ;;  %s394_s8 = sshll.u32 %s658_s1, 3  ;;  %s658_s1 = sphi %s843_s1, %s109_s1   ;;  %v654_v56 = vphi %v841_v56, %v345_v56   ;;  %v650_v52 = vphi %v839_v52, %v346_v52   ;;  %v646_v54 = vphi %v837_v54, %v339_v54   ;;  %v642_v50 = vphi %v835_v50, %v340_v50  }
  0x41   : > { %1008 = vst [vmem:[#allocation38_spill] sm:$0xff] %v650_v52  ;;  %1009 = vst [vmem:[#allocation39_spill] sm:$0xff] %v654_v56  ;;  %v1011_v5 = vld [vmem:[#allocation16_spill] sm:$0xff]  ;;  %v1013_v4 = vld [vmem:[#allocation15_spill] sm:$0xff]  ;;  %s929_s7 = scalar_lea.vmem [#allocation2], %s403_s6  ;;  %s349_s9 = ssub.s32 15, %s658_s1 }
  0x42   : > { %v404_v62 = vpack.c.bf16 %v1011_v5, %v1010_v1  ;;  %v406_v58 = vpack.c.bf16 %v1013_v4, %v1012_v0  ;;  %v1014_v9 = vld [vmem:[#allocation20_spill] sm:$0xff]  ;;  %v1016_v3 = vld [vmem:[#allocation14_spill] sm:$0xff]  ;;  %v1018_v2 = vld [vmem:[#allocation13_spill] sm:$0xff]  ;;  %s402_s10 = sshll.u32 %s349_s9, 3  ;;  %s347_s11 = scalar_lea.vmem [#allocation7], %s394_s8 }
  0x43   : > { %v1015_v13 = vld [vmem:[#allocation24_spill] sm:$0xff]  ;;  %v1017_v7 = vld [vmem:[#allocation18_spill] sm:$0xff]  ;;  %v1019_v6 = vld [vmem:[#allocation17_spill] sm:$0xff]  ;;  %s351_s12 = scalar_lea.vmem [#allocation7], %s402_s10  ;;  %s109_s1 = sadd.s32 1, %s658_s1  }
  0x44   : > { %v408_v50 = vpack.c.bf16 %v1015_v13, %v1014_v9  ;;  %405 = vmatprep.subr.bf16.mxu0 %v404_v62  ;;  %v436_v54 = vpack.c.bf16 %v1017_v7, %v1016_v3  ;;  %v438_v52 = vpack.c.bf16 %v1019_v6, %v1018_v2  ;;  %v1020_v8 = vld [vmem:[#allocation19_spill] sm:$0xff]  ;;  %v1022_v11 = vld [vmem:[#allocation22_spill] sm:$0xff]  ;;  %v1024_v17 = vld [vmem:[#allocation28_spill] sm:$0xff]  ;;  %v444_v2 = vpack.c.bf16 %v753_v23, %v745_v19  ;;  %p106_p2 = scmp.ge.s32.totalorder %s109_s1, 8  }
  0x45   : > { %407 = vmatpush1.bf16.msra.mxu0 %v406_v58  ;;  %v1021_v12 = vld [vmem:[#allocation23_spill] sm:$0xff]  ;;  %v1023_v15 = vld [vmem:[#allocation26_spill] sm:$0xff]  ;;  %v412_v0 = vpack.c.bf16 %v749_v21, %v1024_v17  ;;  %v1025_v10 = vld [vmem:[#allocation21_spill] sm:$0xff]  ;;  %v664_v58 = vmov 0.0   ;;  %s665_s13 = smov (%p106_p2), [#allocation7]  }
  0x46   : > { %v410_v56 = vpack.c.bf16 %v1021_v12, %v1020_v8  ;;  %v440_v1 = vpack.c.bf16 %v1023_v15, %v1022_v11  ;;  %409 = vmatprep.subr.bf16.mxu0 %v408_v50  ;;  %437 = vmatprep.subr.bf16.mxu1 %v436_v54  ;;  %v1026_v14 = vld [vmem:[#allocation25_spill] sm:$0xff]  ;;  %v1027_v16 = vld [vmem:[#allocation27_spill] sm:$0xff]  ;;  %v416_v50 = vpack.c.bf16 %v765_v29, %v757_v25  ;;  %v1031_v5 = vld [vmem:[#allocation32_spill] sm:$0xff]  ;;  %s358_s14 = sshll.u32 (%p106_p2), %s665_s13, 4  ;;  %s359_s14 = int_to_ptr.vmem [resolvable:$true] %s358_s14 }
  0x47   : > { %439 = vmatpush1.bf16.msra.mxu1 %v438_v52  ;;  %v442_v62 = vpack.c.bf16 %v1026_v14, %v1025_v10  ;;  %189 = vmatprep.mubr.f32.mxu0 %v664_v58  ;;  %v414_v3 = vpack.c.bf16 %v747_v20, %v1027_v16  ;;  %v1028_v18 = vld [vmem:[#allocation29_spill] sm:$0xff]  ;;  %v418_v54 = vpack.c.bf16 %v763_v28, %v755_v24  ;;  %v120_v9 = vld [vmem:[%s929_s7 + $0x18] sm:$0xff]  ;;  %s592_s15 = scalar_lea.vmem (%p106_p2), %s359_s14, 2048  ;;  %p597_p4 = scmp.lt.s32.totalorder (%p106_p2), %s359_s14, %s359_s14 }
  0x48   : > { %441 = vmatprep.subr.bf16.mxu1 %v440_v1  ;;  %266 = vmatprep.mubr.f32.mxu1 %v664_v58  ;;  %v446_v52 = vpack.c.bf16 %v751_v22, %v1028_v18  ;;  %v448_v1 = vpack.c.bf16 %v769_v31, %v761_v27  ;;  %v123_v17 = vld [vmem:[%s929_s7 + $0x30] sm:$0xff]  ;;  %p593_p3 = scmp.ne.s32.totalorder (%p106_p2), %s359_s14, %s592_s15  ;;  %p598_p5 = scmp.lt.s32.totalorder (%p106_p2), %s592_s15, %s592_s15 }
  0x49   : > { %411 = vmatpush1.bf16.msra.mxu0 %v410_v56  ;;  %v420_v56 = vpack.c.bf16 %v781_v37, %v773_v33 }
  0x4a   : > { %413 = vmatprep.subr.bf16.mxu0 %v412_v0  ;;  %v450_v0 = vpack.c.bf16 %v767_v30, %v759_v26  ;;  %p599_p6 = por (%p106_p2), %p598_p5, %p597_p4 }
  0x4b   : > { %443 = vmatpush1.bf16.msra.mxu1 %v442_v62  ;;  %v452_v62 = vpack.c.bf16 %v785_v39, %v777_v35 }
  0x4c   : > { %445 = vmatprep.subr.bf16.mxu1 %v444_v2  ;;  %v422_v2 = vpack.c.bf16 %v779_v36, %v771_v32  ;;  %p600_p7 = pnand (%p106_p2), %p599_p6, %p593_p3 }
  0x4d   : > { %415 = vmatpush1.bf16.msra.mxu0 %v414_v3  ;;  %v424_v3 = vpack.c.bf16 %v797_v45, %v789_v41 }
  0x4e   : > { %417 = vmatprep.subr.bf16.mxu0 %v416_v50  ;;  %v454_v50 = vpack.c.bf16 %v783_v38, %v775_v34 }
  0x4f   : > { %447 = vmatpush1.bf16.msra.mxu1 %v446_v52  ;;  %v456_v52 = vpack.c.bf16 %v801_v47, %v793_v43 }
  0x50   : > { %449 = vmatprep.subr.bf16.mxu1 %v448_v1  ;;  %v426_v1 = vpack.c.bf16 %v795_v44, %v787_v40 }
  0x51   : > { %419 = vmatpush1.bf16.msra.mxu0 %v418_v54  ;;  %v428_v54 = vpack.c.bf16 %v813_v53, %v805_v49 }
  0x52   : > { %421 = vmatprep.subr.bf16.mxu0 %v420_v56  ;;  %v458_v56 = vpack.c.bf16 %v799_v46, %v791_v42 }
  0x53   : > { %451 = vmatpush1.bf16.msra.mxu1 %v450_v0  ;;  %v460_v0 = vpack.c.bf16 %v817_v55, %v809_v51 }
  0x54   : > { %453 = vmatprep.subr.bf16.mxu1 %v452_v62  ;;  %v1029_v62 = vld [vmem:[#allocation31_spill] sm:$0xff] }
  0x55   : > { %423 = vmatpush1.bf16.msra.mxu0 %v422_v2  ;;  %v430_v4 = vpack.c.bf16 %v1029_v62, %v803_v48  ;;  %v432_v2 = vpack.c.bf16 %v829_v61, %v821_v57  ;;  %v1033_v62 = vld [vmem:[#allocation34_spill] sm:$0xff] }
  0x56   : > { %425 = vmatprep.subr.bf16.mxu0 %v424_v3  ;;  %v1030_v3 = vld [vmem:[#allocation30_spill] sm:$0xff] }
  0x57   : > { %455 = vmatpush1.bf16.msra.mxu1 %v454_v50  ;;  %v462_v6 = vpack.c.bf16 %v1031_v5, %v1030_v3  ;;  %v464_v50 = vpack.c.bf16 %v833_v63, %v825_v59  ;;  %v1036_v5 = vld [vmem:[#allocation38_spill] sm:$0xff] }
  0x58   : > { %457 = vmatprep.subr.bf16.mxu1 %v456_v52  ;;  %v1032_v52 = vld [vmem:[#allocation33_spill] sm:$0xff] }
  0x59   : > { %427 = vmatpush1.bf16.msra.mxu0 %v426_v1  ;;  %v434_v1 = vpack.c.bf16 %v827_v60, %v1032_v52 }
  0x5a   : > { %429 = vmatprep.subr.bf16.mxu0 %v428_v54  ;;  %v1034_v54 = vld [vmem:[#allocation35_spill] sm:$0xff] }
  0x5b   : > { %459 = vmatpush1.bf16.msra.mxu1 %v458_v56  ;;  %v466_v7 = vpack.c.bf16 %v1034_v54, %v1033_v62  ;;  %v1035_v56 = vld [vmem:[#allocation39_spill] sm:$0xff] }
  0x5c   : > { %461 = vmatprep.subr.bf16.mxu1 %v460_v0 }
  0x5d   : > { %431 = vmatpush1.bf16.msra.mxu0 %v430_v4  ;;  %v117_v4 = vld [vmem:[%s929_s7] sm:$0xff] }
  0x5e   : > { %433 = vmatprep.subr.bf16.mxu0 %v432_v2 }
  0x5f   : > { %463 = vmatpush1.bf16.msra.mxu1 %v462_v6  ;;  %v118_v6 = vld [vmem:[%s929_s7 + $0x8] sm:$0xff] }
  0x60   : > { %465 = vmatprep.subr.bf16.mxu1 %v464_v50 }
  0x61   : > { %435 = vmatpush1.bf16.msra.mxu0 %v434_v1  ;;  %v122_v1 = vld [vmem:[%s929_s7 + $0x28] sm:$0xff] }
  0x63   : > { %467 = vmatpush1.bf16.msra.mxu1 %v466_v7 }
  0x64   : > { %190 = vmatmul.mubr.f32.vlgmr.msra.gmra.mrb[0].mxu0 %v1035_v56 }
  0x65   : > { %195 = vmatprep.mubr.f32.mxu0 %v664_v58 }
  0x66   : > { %267 = vmatmul.mubr.f32.vlgmr.msra.gmra.mrb[0].mxu1 %v1035_v56 }
  0x67   : > { %272 = vmatprep.mubr.f32.mxu1 %v664_v58  ;;  %v121_v58 = vld [vmem:[%s929_s7 + $0x20] sm:$0xff] }
  0x68   : > { %196 = vmatmul.mubr.f32.gmra.mrb[2].mxu0 %v1036_v5 }
  0x6a   : > { %273 = vmatmul.mubr.f32.gmra.mrb[2].mxu1 %v1036_v5 }
 0x137   : > { %v191_v7 = vpop.f32.mrb[0].mxu0 }
 0x138   : > { %v279_v0 = vadd.f32 %v191_v7, %v117_v4  ;;  %v193_v2 = vpop.f32.mrb[1].mxu0  ;;  %v124_v4 = vld [vmem:[%s929_s7 + $0x38] sm:$0xff] }
 0x139   : > { %v280_v3 = vadd.f32 %v193_v2, %v118_v6  ;;  %v268_v50 = vpop.f32.mrb[0].mxu1 }
 0x13a   : > { %v396_v52 = vmul.f32 -1.442695, %v279_v0  ;;  %v270_v62 = vpop.f32.mrb[1].mxu1  ;;  %v119_v0 = vld [vmem:[%s929_s7 + $0x10] sm:$0xff] }
 0x13b   : > { %v398_v54 = vmul.f32 -1.442695, %v280_v3  ;;  %v197_v8 = vpop.f32.mrb[2].mxu0  ;;  %v282_v14 = vadd.f32 %v270_v62, %v120_v9  ;;  %v281_v3 = vadd.f32 %v268_v50, %v119_v0 }
 0x13c   : > { %516 = vpow2.f32 %v396_v52  ;;  %v283_v10 = vadd.f32 %v197_v8, %v121_v58  ;;  %v199_v11 = vpop.f32.mrb[3].mxu0 }
 0x13d   : > { %518 = vpow2.f32 %v398_v54  ;;  %v284_v12 = vadd.f32 %v199_v11, %v122_v1  ;;  %v274_v13 = vpop.f32.mrb[2].mxu1  ;;  %v400_v16 = vmul.f32 -1.442695, %v282_v14 }
 0x13e   : > { %v397_v7 = vmul.f32 -1.442695, %v283_v10  ;;  %v276_v6 = vpop.f32.mrb[3].mxu1  ;;  %v285_v11 = vadd.f32 %v274_v13, %v123_v17  ;;  %v1037_v13 = vld [vmem:[#allocation37_spill] sm:$0xff] }
 0x13f   : > { %v399_v2 = vmul.f32 -1.442695, %v284_v12  ;;  %v286_v15 = vadd.f32 %v276_v6, %v124_v4 }
 0x140   : > { %520 = vpow2.f32 %v397_v7 }
 0x141   : > { %522 = vpow2.f32 %v399_v2  ;;  %v401_v18 = vmul.f32 -1.442695, %v286_v15 }
 0x142   : > { %524 = vpow2.f32 %v400_v16 }
 0x143   : > { %526 = vtanh.f32 %v281_v3 }
 0x144   : > { %528 = vpow2.f32 %v401_v18 }
 0x146   : > { %v517_v52 = vpop.eup %516 }
 0x147   : > { %v519_v8 = vpop.eup %518  ;;  %v293_v58 = vadd.f32 1.0, %v517_v52 }
 0x148   : > { %v305_v1 = vadd.f32 1.0, %v519_v8  ;;  %v1038_v8 = vld [vmem:[#allocation36_spill] sm:$0xff] }
 0x149   : > { %530 = vrcp.f32 %v293_v58 }
 0x14a   : > { %v521_v9 = vpop.eup %520  ;;  %532 = vrcp.f32 %v305_v1 }
 0x14b   : > { %v523_v10 = vpop.eup %522  ;;  %v294_v12 = vadd.f32 1.0, %v521_v9  ;;  %534 = vtanh.f32 %v285_v11 }
 0x14c   : > { %v306_v62 = vadd.f32 1.0, %v523_v10  ;;  %v525_v14 = vpop.eup %524 }
 0x14d   : > { %536 = vrcp.f32 %v294_v12  ;;  %v527_v50 = vpop.eup %526  ;;  %v319_v16 = vadd.f32 1.0, %v525_v14 }
 0x14e   : > { %538 = vrcp.f32 %v306_v62  ;;  %v529_v15 = vpop.eup %528 }
 0x14f   : > { %540 = vrcp.f32 %v319_v16  ;;  %v320_v0 = vadd.f32 1.0, %v529_v15 }
 0x153   : > { %v531_v54 = vpop.eup %530 }
 0x154   : > { %v533_v4 = vpop.eup %532  ;;  %v327_v7 = vmul.f32 %v531_v54, %v527_v50 }
 0x155   : > { %v535_v6 = vpop.eup %534  ;;  %v325_v17 = vmul.f32 %v1037_v13, %v533_v4 }
 0x157   : > { %v537_v18 = vpop.eup %536  ;;  %v329_v2 = vadd.f32 %v327_v7, %v325_v17 }
 0x158   : > { %v539_v3 = vpop.eup %538  ;;  %v328_v52 = vmul.f32 %v537_v18, %v535_v6 }
 0x159   : > { %v326_v58 = vmul.f32 %v1038_v8, %v539_v3  ;;  %542 = vtanh.f32 %v329_v2  ;;  %v335_v11 = vsub.f32 %v329_v2, %v1037_v13  ;;  %v541_v62 = vpop.eup %540 }
 0x15a   : > { %544 = vrcp.f32 %v320_v0 }
 0x15b   : > { %v337_v1 = vmul.f32 0.9, %v335_v11  ;;  %v330_v9 = vadd.f32 %v328_v52, %v326_v58 }
 0x15d   : > { %v339_v54 = vadd.f32 %v1037_v13, %v337_v1   ;;  %546 = vtanh.f32 %v330_v9  ;;  %v336_v10 = vsub.f32 %v330_v9, %v1038_v8 }
 0x15f   : > { %v338_v12 = vmul.f32 0.9, %v336_v10 }
 0x161   : > { %v340_v50 = vadd.f32 %v1038_v8, %v338_v12  }
 0x163   : > { %v543_v14 = vpop.eup %542 }
 0x164   : > { %v333_v15 = vmul.f32 %v543_v14, %v541_v62  ;;  %v545_v16 = vpop.eup %544 }
 0x166   : > { %v341_v4 = vsub.f32 %v333_v15, %v1035_v56 }
 0x167   : > { %v547_v7 = vpop.eup %546 }
 0x168   : > { %v343_v6 = vmul.f32 0.9, %v341_v4  ;;  %v334_v17 = vmul.f32 %v547_v7, %v545_v16 }
 0x16a   : > { %v345_v56 = vadd.f32 %v1035_v56, %v343_v6   ;;  %v342_v13 = vsub.f32 %v334_v17, %v1036_v5  ;;  %108 = sbr.rel (!%p106_p2) target bundleno = 64 (0x40), region = 46 }
 0x16c   : > { %348 = vst [vmem:[%s347_s11] sm:$0xff] %v345_v56  ;;  %v344_v18 = vmul.f32 0.9, %v342_v13 }
 0x16e   : > { %v346_v52 = vadd.f32 %v1036_v5, %v344_v18  }
 0x170   : > { %352 = vst [vmem:[%s351_s12] sm:$0xff] %v346_v52 }
 0x171   :  { %603 = shalt.err (!%p600_p7)
}
 0x172   :  { %s604_s18 = scalar_lea.hbm %s976_s2, 2048 }
 0x173   :  { %p605_p8 = scmp.ne.s32.totalorder %s976_s2, %s604_s18  ;;  %p608_p9 = scmp.lt.u32.totalorder %s604_s18, %s976_s2 }
 0x175   :  { %p610_p10 = pnand %p608_p9, %p605_p8 }
 0x177   :  { %613 = shalt.err (!%p610_p10)
}
 0x178   :  { %s666_s23 = smov 128   ;;  %s667_s24 = smov 8  }
 0x179   :  { %364 = dma.vmem_to_hbm [thread:$0]  %s359_s14, 2048, %s976_s2, [#allocation4], %s666_s23, %s666_s23, %s667_s24  }
 0x17a   :  { %638 = dma.done.wait [#allocation4], 2048  }
 0x17b   :  { %639 = vsyncadd [#allocation4], 4294965248 }
 0x17c   :  { %368 = vsyncpa [#allocation3], 1 }
 0x17d   :  { %369 = vsyncpa [#allocation6], 1 }
 0x17e   :  { %370 = vsyncpa [#allocation4], 1 }

</bundles_post_ra>
